<compile_context>
chip_gen: v7x
topology: tpu7x:2x2x1
jax: 0.10.0
libtpu: 0.0.40
codegen_flags: <defaults>
</compile_context>

<pallas_src>
import math
import functools

import numpy as np
import jax
import jax.numpy as jnp
from jax.experimental import pallas as pl
from jax.experimental.pallas import tpu as pltpu


# ---------------------------------------------------------------------------
# Small helpers
# ---------------------------------------------------------------------------

def _pick_tile(dim, max_tile, mult):
    """Largest tile <= max_tile that divides `dim` and is a multiple of `mult`
    (falls back to the full dimension, which is always legal)."""
    if dim <= max_tile:
        return dim
    t = (max_tile // mult) * mult
    while t >= mult:
        if dim % t == 0:
            return t
        t -= mult
    return dim


# ---------------------------------------------------------------------------
# Generic tiled linear (used only for the tiny timestep-embedding MLP)
# ---------------------------------------------------------------------------

def _linear_kernel(x_ref, w_ref, b_ref, o_ref):
    o_ref[...] = (jnp.dot(x_ref[...], w_ref[...],
                          preferred_element_type=jnp.float32)
                  + b_ref[...]).astype(o_ref.dtype)


def pallas_linear(x, w, b, *, max_tile_m=256, max_tile_n=512):
    """x: (M, Cin), w: (Cin, Cout), b: (Cout,) -> (M, Cout)."""
    m, cin = x.shape
    cout = w.shape[1]
    tm = _pick_tile(m, max_tile_m, 8)
    tn = _pick_tile(cout, max_tile_n, 128)
    # TODO(synk): add a K-reduction grid axis + f32 VMEM accumulator for very
    #             large Cin (not needed at these channel counts).
    return pl.pallas_call(
        _linear_kernel,
        out_shape=jax.ShapeDtypeStruct((m, cout), x.dtype),
        grid_spec=pltpu.PrefetchScalarGridSpec(
            num_scalar_prefetch=0,
            grid=(pl.cdiv(m, tm), pl.cdiv(cout, tn)),
            in_specs=[
                pl.BlockSpec((tm, cin), lambda i, j: (i, 0)),
                pl.BlockSpec((cin, tn), lambda i, j: (0, j)),
                pl.BlockSpec((1, tn), lambda i, j: (0, j)),
            ],
            out_specs=pl.BlockSpec((tm, tn), lambda i, j: (i, j)),
        ),
        compiler_params=pltpu.CompilerParams(
            dimension_semantics=("parallel", "parallel")),
    )(x, w, b.reshape(1, cout))


# ---------------------------------------------------------------------------
# Fused AdaLayerNorm + QKV projection (emits channel-first q, k, v)
# ---------------------------------------------------------------------------

def _adaln_qkv_kernel(x_ref, scale_ref, shift_ref, wt_ref, b_ref,
                      q_ref, k_ref, v_ref, *, eps, C):
    # x_ref: (1, thw, C); scale/shift: (1, 1, C); wt: (3C, C); b: (3C, 1)
    # q/k/v out blocks: (1, C, thw) -- channel-first.
    x = x_ref[0].astype(jnp.float32)                        # (thw, C)
    mean = jnp.mean(x, axis=-1, keepdims=True)
    var = jnp.mean((x - mean) ** 2, axis=-1, keepdims=True)
    xn = (x - mean) * jax.lax.rsqrt(var + eps)
    xn = (xn * (1.0 + scale_ref[0].astype(jnp.float32))
          + shift_ref[0].astype(jnp.float32))               # (thw, C)

    # (3C, thw) = wt @ xn^T   ("NT" matmul on the MXU)
    qkv = jax.lax.dot_general(
        wt_ref[...].astype(jnp.float32), xn,
        dimension_numbers=(((1,), (1,)), ((), ())),
        preferred_element_type=jnp.float32)
    qkv = qkv + b_ref[...].astype(jnp.float32)              # bias over channels

    q_ref[0] = qkv[0 * C:1 * C].astype(q_ref.dtype)
    k_ref[0] = qkv[1 * C:2 * C].astype(k_ref.dtype)
    v_ref[0] = qkv[2 * C:3 * C].astype(v_ref.dtype)


def adaln_qkv(x, scale_t, shift_t, w, b, *, eps=1e-5):
    """x: (B, HW, C); scale/shift: (B, 1, C); w: (C, 3C); b: (3C,)
    -> q, k, v each (B, C, HW) (channel-first)."""
    B, HW, C = x.shape
    C3 = w.shape[1]
    thw = _pick_tile(HW, 1024, 128)
    wt = w.T                                   # (3C, C), tiny host-side transpose
    bcol = b.reshape(C3, 1)
    out_shape = tuple(jax.ShapeDtypeStruct((B, C, HW), x.dtype) for _ in range(3))
    kernel = functools.partial(_adaln_qkv_kernel, eps=eps, C=C)
    return pl.pallas_call(
        kernel,
        out_shape=out_shape,
        grid_spec=pltpu.PrefetchScalarGridSpec(
            num_scalar_prefetch=0,
            grid=(B, HW // thw),
            in_specs=[
                pl.BlockSpec((1, thw, C), lambda b_, t_: (b_, t_, 0)),
                pl.BlockSpec((1, 1, C), lambda b_, t_: (b_, 0, 0)),
                pl.BlockSpec((1, 1, C), lambda b_, t_: (b_, 0, 0)),
                pl.BlockSpec((C3, C), lambda b_, t_: (0, 0)),
                pl.BlockSpec((C3, 1), lambda b_, t_: (0, 0)),
            ],
            out_specs=(
                pl.BlockSpec((1, C, thw), lambda b_, t_: (b_, 0, t_)),
                pl.BlockSpec((1, C, thw), lambda b_, t_: (b_, 0, t_)),
                pl.BlockSpec((1, C, thw), lambda b_, t_: (b_, 0, t_)),
            ),
        ),
        compiler_params=pltpu.CompilerParams(
            dimension_semantics=("parallel", "parallel")),
    )(x, scale_t, shift_t, wt, bcol)


# ---------------------------------------------------------------------------
# Neighborhood attention (online softmax, lane-dense layout)
# ---------------------------------------------------------------------------

def _na2d_attn_kernel(q_ref, k_ref, v_ref, bias_ref, o_ref, *, K, scale):
    """One (batch, head) slice.

    q/k/v/o blocks: (1, hd, H, W) -- W on lanes, H on sublanes, hd unrolled
    across vregs.  bias block: (1, K*K, H, W).
    NATTEN boundary rule (dilation=1): neighborhood start = clamp(i - r, 0, L - K).
    """
    _, hd, H, W = q_ref.shape
    r = K // 2

    q = q_ref[0].astype(jnp.float32) * scale                # (hd, H, W)
    k = k_ref[0].astype(jnp.float32)
    v = v_ref[0].astype(jnp.float32)
    bias = bias_ref[0].astype(jnp.float32)                  # (K*K, H, W)

    # Loop-invariant lane index + border masks (hoisted: JAX does not CSE
    # broadcast_in_dim, so re-emitting these per K*K iteration wastes VPU).
    lane = jax.lax.broadcasted_iota(jnp.int32, (hd, H, W), 2)
    is_left = lane < r
    is_right = lane > (W - 1 - r)

    def shift_lane(x, off):
        # y[..., j] = x[..., clamp(j - r, 0, W - K) + off]   (lane axis)
        amt = (r - off) % W
        rolled = pltpu.roll(x, amt, axis=2) if amt else x
        left = x[:, :, off:off + 1]
        right = x[:, :, W - K + off:W - K + off + 1]
        return jnp.where(is_left, left, jnp.where(is_right, right, rolled))

    def shift_sublane(x, off):
        # y[:, i, :] = x[:, clamp(i - r, 0, H - K) + off, :] (sublane axis)
        top = x[:, off:off + 1, :]
        mid = x[:, off:off + H - K + 1, :]
        bot = x[:, H - K + off:H - K + off + 1, :]
        return jnp.concatenate([top] * r + [mid] + [bot] * r, axis=1)

    # Online (flash-style) softmax over the K*K window offsets.
    m = jnp.full((H, W), -jnp.inf, dtype=jnp.float32)
    l = jnp.zeros((H, W), dtype=jnp.float32)
    acc = jnp.zeros((hd, H, W), dtype=jnp.float32)

    for kj in range(K):                       # lane shifts hoisted: 2*K rolls total
        k_col = shift_lane(k, kj)
        v_col = shift_lane(v, kj)
        for ki in range(K):                   # cheap sublane shifts inner
            k_rc = shift_sublane(k_col, ki)
            v_rc = shift_sublane(v_col, ki)
            # dot over head_dim = VPU multiply-adds across vregs (no lane reduce)
            s = jnp.sum(q * k_rc, axis=0) + bias[ki * K + kj]
            m_new = jnp.maximum(m, s)
            alpha = jnp.exp(m - m_new)
            p = jnp.exp(s - m_new)
            l = alpha * l + p
            acc = alpha[None] * acc + p[None] * v_rc
            m = m_new

    inv_l = pl.reciprocal(l, approx=True)
    o_ref[0] = (acc * inv_l[None]).astype(o_ref.dtype)


def na2d_attention(q, k, v, bias_map, num_heads, kernel_size, scale):
    """q, k, v: (B, C, H, W) channel-first; bias_map: (nh, K*K, H, W)
    -> (B, C, H, W) with channel = head * hd + d."""
    B, C, H, W = q.shape
    hd = C // num_heads
    KK = kernel_size * kernel_size
    kernel = functools.partial(_na2d_attn_kernel, K=kernel_size, scale=scale)
    # TODO(synk): halo-tiled spatial blocking for very large H*W (per-step block
    #             here is one (head_dim, H, W) slice per tensor).
    return pl.pallas_call(
        kernel,
        out_shape=jax.ShapeDtypeStruct((B, C, H, W), q.dtype),
        grid_spec=pltpu.PrefetchScalarGridSpec(
            num_scalar_prefetch=0,
            grid=(B, num_heads),
            in_specs=[
                pl.BlockSpec((1, hd, H, W), lambda b, h: (b, h, 0, 0)),
                pl.BlockSpec((1, hd, H, W), lambda b, h: (b, h, 0, 0)),
                pl.BlockSpec((1, hd, H, W), lambda b, h: (b, h, 0, 0)),
                # bias indexed by head only -- never duplicated over batch
                pl.BlockSpec((1, KK, H, W), lambda b, h: (h, 0, 0, 0)),
            ],
            out_specs=pl.BlockSpec((1, hd, H, W), lambda b, h: (b, h, 0, 0)),
        ),
        compiler_params=pltpu.CompilerParams(
            dimension_semantics=("parallel", "parallel")),
    )(q, k, v, bias_map)


# ---------------------------------------------------------------------------
# Output projection (consumes channel-first input, writes channels-last)
# ---------------------------------------------------------------------------

def _proj_kernel(x_ref, w_ref, b_ref, o_ref):
    # x_ref: (1, C, thw); w_ref: (C, Cout); b_ref: (1, Cout); o_ref: (1, thw, Cout)
    out = jax.lax.dot_general(
        x_ref[0].astype(jnp.float32), w_ref[...].astype(jnp.float32),
        dimension_numbers=(((0,), (0,)), ((), ())),      # "TN" matmul
        preferred_element_type=jnp.float32)
    o_ref[0] = (out + b_ref[...].astype(jnp.float32)).astype(o_ref.dtype)


def proj_linear(x_cf, w, b):
    """x_cf: (B, C, HW) channel-first -> (B, HW, Cout) channels-last."""
    B, C, HW = x_cf.shape
    cout = w.shape[1]
    thw = _pick_tile(HW, 1024, 128)
    return pl.pallas_call(
        _proj_kernel,
        out_shape=jax.ShapeDtypeStruct((B, HW, cout), x_cf.dtype),
        grid_spec=pltpu.PrefetchScalarGridSpec(
            num_scalar_prefetch=0,
            grid=(B, HW // thw),
            in_specs=[
                pl.BlockSpec((1, C, thw), lambda b_, t_: (b_, 0, t_)),
                pl.BlockSpec((C, cout), lambda b_, t_: (0, 0)),
                pl.BlockSpec((1, cout), lambda b_, t_: (0, 0)),
            ],
            out_specs=pl.BlockSpec((1, thw, cout), lambda b_, t_: (b_, t_, 0)),
        ),
        compiler_params=pltpu.CompilerParams(
            dimension_semantics=("parallel", "parallel")),
    )(x_cf, w, b.reshape(1, cout))


# ---------------------------------------------------------------------------
# Relative-position bias map (NATTEN semantics, dilation=1)
# ---------------------------------------------------------------------------

def _na2d_bias_map(rpb, H, W, K):
    """bias[h, ki*K+kj, i, j] = rpb[h, pb(i)+ki, pb(j)+kj]  -> (nh, K*K, H, W)."""
    r = K // 2

    def pb_start(idx, L):
        return np.where(idx < r, 2 * r - idx, np.where(idx + r >= L, L - 1 - idx, r))

    pi = pb_start(np.arange(H), H)
    pj = pb_start(np.arange(W), W)
    ri = pi[:, None] + np.arange(K)[None, :]            # (H, K)
    cj = pj[:, None] + np.arange(K)[None, :]            # (W, K)
    A = ri.T[:, None, :, None]                          # (K, 1, H, 1)
    Bx = cj.T[None, :, None, :]                         # (1, K, 1, W)
    bias = rpb[:, A, Bx]                                # (nh, K, K, H, W)
    return bias.reshape(rpb.shape[0], K * K, H, W)


# ---------------------------------------------------------------------------
# Parameters and full forward
# ---------------------------------------------------------------------------

def init_params(key, dim, num_heads, kernel_size):
    ks = jax.random.split(key, 6)
    s = 0.1
    return {
        "ln_w": s * jax.random.normal(ks[0], (dim, 2 * dim), jnp.float32),
        "ln_b": jnp.zeros((2 * dim,), jnp.float32),
        "qkv_w": s * jax.random.normal(ks[1], (dim, 3 * dim), jnp.float32),
        "qkv_b": s * jax.random.normal(ks[2], (3 * dim,), jnp.float32),
        "rpb": 0.02 * jax.random.normal(
            ks[3], (num_heads, 2 * kernel_size - 1, 2 * kernel_size - 1), jnp.float32),
        "proj_w": s * jax.random.normal(ks[4], (dim, dim), jnp.float32),
        "proj_b": s * jax.random.normal(ks[5], (dim,), jnp.float32),
    }


def forward(params, x, cond, t, *, num_heads, kernel_size, dilation=1,
            diffusion_step=100, rescale_steps=4000.0):
    del cond  # unused by the reference forward as well
    B, H, W, C = x.shape
    head_dim = C // num_heads
    scale = head_dim ** -0.5
    window = kernel_size * dilation
    assert dilation == 1               # TODO(synk): dilation > 1 window indexing
    assert H >= window and W >= window  # TODO(synk): small-input padding path

    # --- AdaLayerNorm timestep path: sinusoidal embedding -> SiLU -> Linear ---
    half = C // 2
    freqs = jnp.exp(jnp.arange(half, dtype=jnp.float32) * -(math.log(10000.0) / (half - 1)))
    ts = t.astype(jnp.float32) / float(diffusion_step) * float(rescale_steps)
    emb = ts[:, None] * freqs[None, :]
    emb = jnp.concatenate([jnp.sin(emb), jnp.cos(emb)], axis=-1)         # (B, C)
    emb = pallas_linear(jax.nn.silu(emb), params["ln_w"], params["ln_b"])  # (B, 2C)
    scale_t = emb[:, :C].reshape(B, 1, C)
    shift_t = emb[:, C:].reshape(B, 1, C)

    # --- Fused AdaLN + QKV projection (channel-first q, k, v; no transposes) ---
    xf = x.reshape(B, H * W, C)
    q, k, v = adaln_qkv(xf, scale_t, shift_t, params["qkv_w"], params["qkv_b"])
    q = q.reshape(B, C, H, W)
    k = k.reshape(B, C, H, W)
    v = v.reshape(B, C, H, W)

    # --- Neighborhood attention (online softmax + rpb bias) ---
    bias_map = _na2d_bias_map(params["rpb"], H, W, kernel_size)          # (nh, KK, H, W)
    attn = na2d_attention(q, k, v, bias_map, num_heads, kernel_size, scale)  # (B, C, H, W)

    # --- Output projection (consumes channel-first, emits channels-last) ---
    out = proj_linear(attn.reshape(B, C, H * W), params["proj_w"], params["proj_b"])
    return out.reshape(B, H, W, C), None, t


# ---------------------------------------------------------------------------
# Pure-JAX reference (gather-based NATTEN semantics) for correctness checking
# ---------------------------------------------------------------------------

def reference_forward(params, x, t, *, num_heads, kernel_size,
                      diffusion_step=100, rescale_steps=4000.0):
    B, H, W, C = x.shape
    hd = C // num_heads
    scale = hd ** -0.5
    K = kernel_size
    r = K // 2

    half = C // 2
    freqs = jnp.exp(jnp.arange(half, dtype=jnp.float32) * -(math.log(10000.0) / (half - 1)))
    ts = t.astype(jnp.float32) / float(diffusion_step) * float(rescale_steps)
    emb = ts[:, None] * freqs[None, :]
    emb = jnp.concatenate([jnp.sin(emb), jnp.cos(emb)], axis=-1)
    emb = jax.nn.silu(emb) @ params["ln_w"] + params["ln_b"]
    sc, sh = emb[:, None, :C], emb[:, None, C:]

    xf = x.reshape(B, H * W, C)
    mean = xf.mean(-1, keepdims=True)
    var = ((xf - mean) ** 2).mean(-1, keepdims=True)
    xn = (xf - mean) / jnp.sqrt(var + 1e-5)
    xn = (xn * (1.0 + sc) + sh).reshape(B * H * W, C)

    qkv = xn @ params["qkv_w"] + params["qkv_b"]
    qkv = qkv.reshape(B, H, W, 3, num_heads, hd).transpose(3, 0, 4, 1, 2, 5)
    q, k, v = qkv[0] * scale, qkv[1], qkv[2]

    ri = np.clip(np.arange(H) - r, 0, H - K)[:, None] + np.arange(K)[None, :]
    cj = np.clip(np.arange(W) - r, 0, W - K)[:, None] + np.arange(K)[None, :]
    kw = k[:, :, ri[:, None, :, None], cj[None, :, None, :], :]   # (B,nh,H,W,K,K,hd)
    vw = v[:, :, ri[:, None, :, None], cj[None, :, None, :], :]
    logits = jnp.einsum("bnhwd,bnhwijd->bnhwij", q, kw)
    bias = _na2d_bias_map(params["rpb"], H, W, K)
    bias = bias.reshape(num_heads, K, K, H, W).transpose(0, 3, 4, 1, 2)
    logits = logits + bias[None]
    attn = jax.nn.softmax(logits.reshape(B, num_heads, H, W, K * K), axis=-1)
    attn = attn.reshape(B, num_heads, H, W, K, K)
    out = jnp.einsum("bnhwij,bnhwijd->bnhwd", attn, vw)
    out = out.transpose(0, 2, 3, 1, 4).reshape(B * H * W, C)
    out = out @ params["proj_w"] + params["proj_b"]
    return out.reshape(B, H, W, C)


# ---------------------------------------------------------------------------

if __name__ == "__main__":
    B, H, W, C = 2, 8, 8, 32
    num_heads, kernel_size, diffusion_step = 4, 3, 100

    key = jax.random.PRNGKey(0)
    kx, kc, kt, kp = jax.random.split(key, 4)
    x = jax.random.normal(kx, (B, H, W, C), jnp.float32)
    cond = jax.random.normal(kc, (B, 16, C), jnp.float32)   # unused by the module's forward
    t = jax.random.randint(kt, (B,), 0, diffusion_step)

    params = init_params(kp, C, num_heads, kernel_size)

    out, _, t_out = forward(params, x, cond, t,
                            num_heads=num_heads, kernel_size=kernel_size,
                            diffusion_step=diffusion_step)
    out = jax.block_until_ready(out)

    ref = reference_forward(params, x, t,
                            num_heads=num_heads, kernel_size=kernel_size,
                            diffusion_step=diffusion_step)
    ref = jax.block_until_ready(ref)

    assert out.shape == (B, H, W, C)
    # tolerance accounts for approx reciprocal in the softmax normalization
    np.testing.assert_allclose(np.asarray(out), np.asarray(ref), atol=2e-3, rtol=2e-3)
    print("KERNEL_OK")
</pallas_src>

<mosaic_0001>
module attributes {stable_mosaic.version = 11 : i64} {
  func.func @_linear_kernel(%arg0: i32, %arg1: i32, %arg2: memref<2x32xf32, #tpu.memory_space<vmem>>, %arg3: memref<32x64xf32, #tpu.memory_space<vmem>>, %arg4: memref<1x64xf32, #tpu.memory_space<vmem>>, %arg5: memref<2x64xf32, #tpu.memory_space<vmem>>) attributes {dimension_semantics = [#tpu.dimension_semantics<parallel>, #tpu.dimension_semantics<parallel>], iteration_bounds = array<i64: 1, 1>, scalar_prefetch = 0 : i64, scratch_operands = 0 : i64, tpu.core_type = #tpu.core_type<tc>, window_params = [{transform_indices = @transform_0, window_bounds = array<i64: 2, 32>}, {transform_indices = @transform_1, window_bounds = array<i64: 32, 64>}, {transform_indices = @transform_2, window_bounds = array<i64: 1, 64>}, {transform_indices = @transform_3, window_bounds = array<i64: 2, 64>}]} {
    %c0 = arith.constant 0 : index
    %c0_0 = arith.constant 0 : index
    %0 = vector.load %arg2[%c0, %c0_0] : memref<2x32xf32, #tpu.memory_space<vmem>>, vector<2x32xf32>
    %c0_1 = arith.constant 0 : index
    %c0_2 = arith.constant 0 : index
    %1 = vector.load %arg3[%c0_1, %c0_2] : memref<32x64xf32, #tpu.memory_space<vmem>>, vector<32x64xf32>
    %cst = arith.constant dense<0.000000e+00> : vector<2x64xf32>
    %2 = tpu.matmul %0, %1, %cst {dimension_numbers = #tpu.dot_dimension_numbers<[1], [0], [0], [1], [0, 0, 1, 1], [], []>} : vector<2x32xf32>, vector<32x64xf32>, vector<2x64xf32> -> vector<2x64xf32>
    %c0_3 = arith.constant 0 : index
    %c0_4 = arith.constant 0 : index
    %3 = vector.load %arg4[%c0_3, %c0_4] : memref<1x64xf32, #tpu.memory_space<vmem>>, vector<1x64xf32>
    %4 = vector.broadcast %3 : vector<1x64xf32> to vector<2x64xf32>
    %5 = arith.addf %2, %4 : vector<2x64xf32>
    %c0_5 = arith.constant 0 : index
    %c0_6 = arith.constant 0 : index
    %6 = vector.load %arg5[%c0_5, %c0_6] : memref<2x64xf32, #tpu.memory_space<vmem>>, vector<2x64xf32>
    tpu.vector_store %arg5[%c0_5, %c0_6], %5 {strides = array<i32>} : memref<2x64xf32, #tpu.memory_space<vmem>>, vector<2x64xf32>,
    return
  }
  func.func @transform_0(%arg0: i32, %arg1: i32) -> (i32, i32) {
    %c0_i32 = arith.constant 0 : i32
    %c0_i32_0 = arith.constant 0 : i32
    return %arg0, %c0_i32 : i32, i32
  }
  func.func @transform_1(%arg0: i32, %arg1: i32) -> (i32, i32) {
    %c0_i32 = arith.constant 0 : i32
    %c0_i32_0 = arith.constant 0 : i32
    return %c0_i32, %arg1 : i32, i32
  }
  func.func @transform_2(%arg0: i32, %arg1: i32) -> (i32, i32) {
    %c0_i32 = arith.constant 0 : i32
    %c0_i32_0 = arith.constant 0 : i32
    return %c0_i32, %arg1 : i32, i32
  }
  func.func @transform_3(%arg0: i32, %arg1: i32) -> (i32, i32) {
    %c0_i32 = arith.constant 0 : i32
    return %arg0, %arg1 : i32, i32
  }
}

</mosaic_0001>

<bundles_post_ra>
// kernel: tpu_custom_call.1
= control target key start
LH: loop header
LB: loop body
LE: loop exit
PB: predicated region body
PF: predicated region fallthrough
CT: control target
= control target key end

     0   :  { %8 = vsyncpa [#allocation3], 0  ;;  %s323_s0 = inlined_call_operand.hbm [shape: f32[2,32], index: 0, kind: input, shape index: {}]   ;;  %s324_s1 = inlined_call_operand.hbm [shape: f32[32,64], index: 1, kind: input, shape index: {}]   ;;  %s325_s2 = inlined_call_operand.vmem [shape: f32[1,64], index: 2, kind: input, shape index: {}]   ;;  %s326_s3 = inlined_call_operand.hbm [shape: f32[2,64], index: 3, kind: output, shape index: {}]  }
   0x1   :  { %9 = vsyncpa [#allocation6], 0 }
   0x2   :  { %10 = vsyncpa [#allocation4], 0  ;;  %s249_s12 = smov [#allocation2]   ;;  %s250_s14 = smov [#allocation5]  }
   0x3   :  { %s17_s13 = sshll.u32 %s249_s12, 4  ;;  %s26_s15 = sshll.u32 %s250_s14, 4  ;;  %s18_s13 = int_to_ptr.vmem [resolvable:$true] %s17_s13  ;;  %s277_s15 = int_to_ptr.vmem [resolvable:$true] %s26_s15 }
   0x4   :  { %s177_s18 = scalar_lea.hbm %s323_s0, 32 }
   0x5   :  { %p178_p0 = scmp.ne.s32.totalorder %s323_s0, %s177_s18  ;;  %p181_p1 = scmp.lt.u32.totalorder %s177_s18, %s323_s0 }
   0x7   :  { %p183_p2 = pnand %p181_p1, %p178_p0 }
   0x9   :  { %186 = shalt.err (!%p183_p2)
}
   0xa   :  { %s187_s23 = scalar_lea.vmem %s18_s13, 32  ;;  %p192_p4 = scmp.lt.s32.totalorder %s18_s13, %s18_s13 }
   0xb   :  { %p188_p3 = scmp.ne.s32.totalorder %s18_s13, %s187_s23  ;;  %p193_p5 = scmp.lt.s32.totalorder %s187_s23, %s187_s23 }
   0xd   :  { %p194_p6 = por %p193_p5, %p192_p4 }
   0xf   :  { %p195_p7 = pnand %p194_p6, %p188_p3 }
  0x11   :  { %198 = shalt.err (!%p195_p7)
}
  0x12   :  { %20 = dma.hbm_to_vmem [thread:$0]  %s323_s0, 32, %s18_s13, [#allocation3]  }
  0x13   :  { %s199_s28 = scalar_lea.hbm %s324_s1, 512 }
  0x14   :  { %p200_p8 = scmp.ne.s32.totalorder %s324_s1, %s199_s28  ;;  %p203_p9 = scmp.lt.u32.totalorder %s199_s28, %s324_s1 }
  0x16   :  { %p205_p10 = pnand %p203_p9, %p200_p8 }
  0x18   :  { %208 = shalt.err (!%p205_p10)
}
  0x19   :  { %s209_s6 = scalar_lea.vmem %s277_s15, 512  ;;  %p214_p12 = scmp.lt.s32.totalorder %s277_s15, %s277_s15 }
  0x1a   :  { %p210_p11 = scmp.ne.s32.totalorder %s277_s15, %s209_s6  ;;  %p215_p13 = scmp.lt.s32.totalorder %s209_s6, %s209_s6 }
  0x1c   :  { %p216_p0 = por %p215_p13, %p214_p12 }
  0x1e   :  { %p217_p1 = pnand %p216_p0, %p210_p11 }
  0x20   :  { %220 = shalt.err (!%p217_p1)
}
  0x21   :  { %s251_s0 = smov 128   ;;  %s252_s7 = smov 8  }
  0x22   :  { %32 = dma.hbm_to_vmem [thread:$0]  %s324_s1, 512, %s277_s15, [#allocation6], %s251_s0, %s251_s0, %s252_s7  }
  0x23   :  { %243 = dma.done.wait [#allocation3], 32  }
  0x24   :  { %244 = vsyncadd [#allocation3], 4294967264 }
  0x25   :  { %245 = dma.done.wait [#allocation6], 512  }
  0x26   :  { %246 = vsyncadd [#allocation6], 4294966784  ;;  %v253_v0 = vmov 0.0|0.0   ;;  %vm254_vm0 = vmmov 0   ;;  %v255_v1 = vmov 0.0   ;;  %v42_v2 = vld [vmem:[#allocation5] sm:$0xff] }
  0x27   :  { %163 = vmatprep.subr.bf16.mxu0 %v253_v0  ;;  %160 = vmatprep.mubr.msk.f32.mxu0 %vm254_vm0, %v255_v1  ;;  %v43_v3 = vld [vmem:[#allocation5 + $0x8] sm:$0xff]  ;;  %v44_v4 = vld [vmem:[#allocation5 + $0x10] sm:$0xff]  ;;  %v45_v6 = vld [vmem:[#allocation5 + $0x18] sm:$0xff]  ;;  %vm53_vm1 = vcmask 261120   ;;  %s256_s11 = smov [#allocation7]   ;;  %vm127_vm2 = vcmask 517120  }
  0x28   :  { %v164_v5 = vpack.c.bf16 %v43_v3, %v42_v2  ;;  %v167_v7 = vpack.c.bf16 %v45_v6, %v44_v4  ;;  %v41_v8 = vld [vmem:[#allocation2] sm:$0x3]  ;;  %s135_s12 = sshll.u32 %s256_s11, 4  ;;  %s136_s12 = int_to_ptr.vmem [resolvable:$true] %s135_s12 }
  0x29   :  { %v145_v9 = vld [vmem:[%s325_s2] ss:$0 sm:$0xff]  ;;  %s221_s13 = scalar_lea.vmem %s136_s12, 32  ;;  %p226_p3 = scmp.lt.s32.totalorder %s136_s12, %s136_s12 }
  0x2a   :  { %165 = vmatpush3.bf16.msra.mxu0 %v164_v5  ;;  %p222_p2 = scmp.ne.s32.totalorder %s136_s12, %s221_s13  ;;  %p227_p4 = scmp.lt.s32.totalorder %s221_s13, %s221_s13 }
  0x2b   :  { %166 = vmatprep.subr.bf16.mxu0 %v253_v0 }
  0x2c   :  { %p228_p5 = por %p227_p4, %p226_p3 }
  0x2e   :  { %168 = vmatpush3.bf16.msra.mxu0 %v167_v7  ;;  %p229_p6 = pnand %p228_p5, %p222_p2 }
  0x31   :  { %161 = vmatmul.mubr.msk.f32.vlgmr.msra.gmra.mrb[0].mxu0 %vm53_vm1, %v41_v8 }
 0x104   :  { %v123_v10 = vpop.f32.mrb[0].mxu0 }
 0x105   :  { %v124_v11 = vadd.f32 %v145_v9, %v123_v10  ;;  %v162_v12 = vpop.f32.mrb[1].mxu0 }
 0x107   :  { %128 = vst.msk [vmem:[#allocation7] sm:$0x3] %vm127_vm2, %v124_v11 }
 0x108   :  { %232 = shalt.err (!%p229_p6)
}
 0x109   :  { %s233_s16 = scalar_lea.hbm %s326_s3, 32 }
 0x10a   :  { %p234_p7 = scmp.ne.s32.totalorder %s326_s3, %s233_s16  ;;  %p237_p8 = scmp.lt.u32.totalorder %s233_s16, %s326_s3 }
 0x10c   :  { %p239_p9 = pnand %p237_p8, %p234_p7 }
 0x10e   :  { %242 = shalt.err (!%p239_p9)
}
 0x10f   :  { %138 = dma.vmem_to_hbm [thread:$0]  %s136_s12, 32, %s326_s3, [#allocation4]  }
 0x110   :  { %247 = dma.done.wait [#allocation4], 32  }
 0x111   :  { %248 = vsyncadd [#allocation4], 4294967264 }
 0x112   :  { %142 = vsyncpa [#allocation3], 1 }
 0x113   :  { %143 = vsyncpa [#allocation6], 1 }
 0x114   :  { %144 = vsyncpa [#allocation4], 1 }

</bundles_post_ra>
